<compile_context>
chip_gen: v7x
topology: tpu7x:2x2x1
jax: 0.10.0
libtpu: 0.0.40
codegen_flags: <defaults>
</compile_context>

<pallas_src>
import math
import functools

import jax
import jax.numpy as jnp
from jax.experimental import pallas as pl
from jax.experimental.pallas import tpu as pltpu

# ----------------------------- config -----------------------------------
B = 2          # batch
S = 8          # sequence length
D_MODEL = 32   # d_model
NHEAD = 4      # heads
D_HEAD = D_MODEL // NHEAD
D_FF = 64      # dim_feedforward
EPS = 1e-5     # LayerNorm eps (PyTorch default)

# ---- packed-parameter layout: every sub-matrix starts on a 128-lane tile ----
_LANE = 128
_STRIDE = ((D_MODEL + _LANE - 1) // _LANE) * _LANE   # 128
Q_OFF = 0
K_OFF = _STRIDE                                      # 128
V_OFF = 2 * _STRIDE                                  # 256
WO_OFF = 3 * _STRIDE                                 # 384
W1_OFF = 4 * _STRIDE                                 # 512
QKV_W = V_OFF + D_MODEL                              # 288 (fused QKV out width)
WBIG_W = W1_OFF + D_FF                               # 576
VP_ROWS = 8 + NHEAD                                  # 12


# ----------------------------- kernel ------------------------------------
def _make_kernel(bs):
    """Kernel processing `bs` batch elements per grid step."""
    n = bs * S

    def decoder_layer_kernel(x_ref, wbig_ref, w2_ref, vp_ref, o_ref):
        # Fuse batch and sequence rows into one (n, D) slab (sublane-tile merge,
        # free) -> bigger MXU M-dim and batched LayerNorm / projection work.
        x2 = x_ref[...].reshape(n, D_MODEL)

        vp = vp_ref[...]                         # (12, 288): biases/LN/head-masks
        bqkv = vp[0:1, :]                        # (1, QKV_W), pieces at Q/K/V_OFF
        bo = vp[1:2, 0:D_MODEL]
        b1 = vp[2:3, 0:D_FF]
        b2 = vp[3:4, 0:D_MODEL]
        g1 = vp[4:5, 0:D_MODEL]
        be1 = vp[5:6, 0:D_MODEL]
        g2 = vp[6:7, 0:D_MODEL]
        be2 = vp[7:8, 0:D_MODEL]

        # ---- fused QKV projection (Q scale pre-folded).  Q/K/V land on their
        # own 128-lane tiles, so the extractions below are free views. ----
        wqkv = wbig_ref[:, 0:QKV_W]              # (D, 288) tile-aligned ref slice
        qkv = jnp.dot(x2, wqkv, preferred_element_type=jnp.float32) + bqkv
        q = qkv[:, Q_OFF:Q_OFF + D_MODEL].reshape(bs, S, D_MODEL)
        k = qkv[:, K_OFF:K_OFF + D_MODEL].reshape(bs, S, D_MODEL)
        v = qkv[:, V_OFF:V_OFF + D_MODEL].reshape(bs, S, D_MODEL)

        # ---- multi-head self-attention via per-head lane masks ----
        # score_h = Q . (K * mask_h) contracts over the full D (masked lanes
        # contribute exact zeros); output merged back with masked adds.
        # No lane slices, no lane concatenate.
        attn_mix = jnp.zeros((bs, S, D_MODEL), jnp.float32)
        for h in range(NHEAD):                   # static loop over heads
            mask_h = vp[8 + h:9 + h, 0:D_MODEL].reshape(1, 1, D_MODEL)
            s = jnp.einsum('bqd,bkd->bqk', q, k * mask_h,
                           preferred_element_type=jnp.float32)   # (bs, S, S)
            s = s - jnp.max(s, axis=-1, keepdims=True)
            p = jnp.exp(s)
            p = p / jnp.sum(p, axis=-1, keepdims=True)
            a = jnp.einsum('bqk,bkd->bqd', p, v,
                           preferred_element_type=jnp.float32)   # (bs, S, D)
            attn_mix = attn_mix + a * mask_h

        # output projection (single matmul on the merged heads)
        wo = wbig_ref[:, WO_OFF:WO_OFF + D_MODEL]
        attn = jnp.dot(attn_mix.reshape(n, D_MODEL), wo,
                       preferred_element_type=jnp.float32) + bo

        # ---- residual + LayerNorm1 (whole slab at once) ----
        y = x2 + attn
        mu = jnp.mean(y, axis=-1, keepdims=True)
        var = jnp.mean((y - mu) ** 2, axis=-1, keepdims=True)
        y = (y - mu) * jax.lax.rsqrt(var + EPS) * g1 + be1

        # ---- feed-forward ----
        w1 = wbig_ref[:, W1_OFF:W1_OFF + D_FF]
        h1 = jnp.maximum(
            jnp.dot(y, w1, preferred_element_type=jnp.float32) + b1, 0.0)
        ff = jnp.dot(h1, w2_ref[...], preferred_element_type=jnp.float32) + b2

        # ---- residual + LayerNorm2 ----
        z = y + ff
        mu2 = jnp.mean(z, axis=-1, keepdims=True)
        var2 = jnp.mean((z - mu2) ** 2, axis=-1, keepdims=True)
        z = (z - mu2) * jax.lax.rsqrt(var2 + EPS) * g2 + be2

        # NOTE: last dim is 32 (<128 lanes) -> masked stores; harmless at 2 KB.
        o_ref[...] = z.reshape(bs, S, D_MODEL)

    return decoder_layer_kernel


# ----------------------------- wrapper ------------------------------------
def _tensorcores_per_chip():
    """2 on v7x, otherwise 1 (safe default)."""
    try:
        kind = jax.devices()[0].device_kind.lower()
    except Exception:
        return 1
    return 2 if "v7" in kind else 1


@functools.partial(jax.jit, static_argnames=("num_steps",))
def _decoder_layer_call(tgt, w_big, w2, vp, num_steps):
    Bsz, Ssz, Dsz = tgt.shape
    bs = Bsz // num_steps
    kernel = _make_kernel(bs)

    def full2d(arr):
        return pl.BlockSpec(arr.shape, lambda b: (0, 0))

    return pl.pallas_call(
        kernel,
        out_shape=jax.ShapeDtypeStruct((Bsz, Ssz, Dsz), jnp.float32),
        grid_spec=pltpu.PrefetchScalarGridSpec(
            num_scalar_prefetch=0,
            grid=(num_steps,),
            in_specs=[
                pl.BlockSpec((bs, Ssz, Dsz), lambda b: (b, 0, 0)),
                full2d(w_big),
                full2d(w2),
                full2d(vp),
            ],
            out_specs=pl.BlockSpec((bs, Ssz, Dsz), lambda b: (b, 0, 0)),
        ),
        compiler_params=pltpu.CompilerParams(
            dimension_semantics=("parallel",)),
    )(tgt, w_big, w2, vp)


def decoder_layer(tgt, packed):
    """tgt: (B, S, D) float32.  packed: dict from pack_params()."""
    Bsz, Ssz, _ = tgt.shape
    cores = _tensorcores_per_chip()
    # Only split the batch across TensorCores when each core gets a sizeable
    # slab (>= 256 rows); tiny batches (like B=2, S=8) run as ONE grid step —
    # the 2-core split cannot amortize its per-step prologue + weight DMAs.
    num_steps = 1
    if cores > 1 and Bsz % cores == 0 and (Bsz // cores) * Ssz >= 256:
        num_steps = cores
    return _decoder_layer_call(tgt, packed["w_big"], packed["w2"], packed["vp"],
                               num_steps=num_steps)


# ----------------------- parameter init & packing --------------------------
def xavier_uniform(key, shape):
    fan_out, fan_in = shape  # PyTorch weight layout (out, in)
    a = math.sqrt(6.0 / (fan_in + fan_out))
    return jax.random.uniform(key, shape, jnp.float32, -a, a)


def init_params(key):
    ks = jax.random.split(key, 8)
    # nn.MultiheadAttention: in_proj_weight (3D, D) xavier_uniform, bias zeros
    in_proj_w = xavier_uniform(ks[0], (3 * D_MODEL, D_MODEL))
    wq_t, wk_t, wv_t = (w.T for w in jnp.split(in_proj_w, 3, axis=0))
    in_proj_b = jnp.zeros((3 * D_MODEL,), jnp.float32)
    bq, bk, bv = jnp.split(in_proj_b, 3)
    out_proj_w = xavier_uniform(ks[1], (D_MODEL, D_MODEL))
    out_proj_b = jnp.zeros((D_MODEL,), jnp.float32)
    w1 = xavier_uniform(ks[2], (D_FF, D_MODEL))
    b1 = jax.random.uniform(ks[3], (D_FF,), jnp.float32,
                            -1.0 / math.sqrt(D_MODEL), 1.0 / math.sqrt(D_MODEL))
    w2 = xavier_uniform(ks[4], (D_MODEL, D_FF))
    b2 = jax.random.uniform(ks[5], (D_MODEL,), jnp.float32,
                            -1.0 / math.sqrt(D_FF), 1.0 / math.sqrt(D_FF))
    return {
        "wq": wq_t, "wk": wk_t, "wv": wv_t,
        "bq": bq.reshape(1, D_MODEL), "bk": bk.reshape(1, D_MODEL),
        "bv": bv.reshape(1, D_MODEL),
        "wo": out_proj_w.T, "bo": out_proj_b.reshape(1, D_MODEL),
        "w1": w1.T, "b1": b1.reshape(1, D_FF),
        "w2": w2.T, "b2": b2.reshape(1, D_MODEL),
        "g1": jnp.ones((1, D_MODEL), jnp.float32),
        "be1": jnp.zeros((1, D_MODEL), jnp.float32),
        "g2": jnp.ones((1, D_MODEL), jnp.float32),
        "be2": jnp.zeros((1, D_MODEL), jnp.float32),
    }


def pack_params(p):
    """One-time packing: fold attention scale into Q, place every sub-matrix /
    vector parameter on a 128-lane-tile-aligned boundary (free in-kernel views)."""
    scale = 1.0 / math.sqrt(D_HEAD)

    w_big = jnp.zeros((D_MODEL, WBIG_W), jnp.float32)
    w_big = w_big.at[:, Q_OFF:Q_OFF + D_MODEL].set(p["wq"] * scale)
    w_big = w_big.at[:, K_OFF:K_OFF + D_MODEL].set(p["wk"])
    w_big = w_big.at[:, V_OFF:V_OFF + D_MODEL].set(p["wv"])
    w_big = w_big.at[:, WO_OFF:WO_OFF + D_MODEL].set(p["wo"])
    w_big = w_big.at[:, W1_OFF:W1_OFF + D_FF].set(p["w1"])

    vp = jnp.zeros((VP_ROWS, QKV_W), jnp.float32)
    vp = vp.at[0, Q_OFF:Q_OFF + D_MODEL].set(p["bq"][0] * scale)
    vp = vp.at[0, K_OFF:K_OFF + D_MODEL].set(p["bk"][0])
    vp = vp.at[0, V_OFF:V_OFF + D_MODEL].set(p["bv"][0])
    vp = vp.at[1, 0:D_MODEL].set(p["bo"][0])
    vp = vp.at[2, 0:D_FF].set(p["b1"][0])
    vp = vp.at[3, 0:D_MODEL].set(p["b2"][0])
    vp = vp.at[4, 0:D_MODEL].set(p["g1"][0])
    vp = vp.at[5, 0:D_MODEL].set(p["be1"][0])
    vp = vp.at[6, 0:D_MODEL].set(p["g2"][0])
    vp = vp.at[7, 0:D_MODEL].set(p["be2"][0])
    # per-head lane masks: row h has 1.0 on head h's D_HEAD columns
    head_masks = jnp.repeat(jnp.eye(NHEAD, dtype=jnp.float32), D_HEAD, axis=1)
    vp = vp.at[8:8 + NHEAD, 0:D_MODEL].set(head_masks)

    return {"w_big": w_big, "w2": p["w2"], "vp": vp}


# ----------------------------- reference ----------------------------------
def decoder_layer_ref(x, p):
    q = x @ p["wq"] + p["bq"]
    k = x @ p["wk"] + p["bk"]
    v = x @ p["wv"] + p["bv"]

    def split_heads(t):  # (B,S,D) -> (B,H,S,Dh)
        return t.reshape(B, S, NHEAD, D_HEAD).transpose(0, 2, 1, 3)

    qh, kh, vh = split_heads(q), split_heads(k), split_heads(v)
    s = jnp.einsum("bhqd,bhkd->bhqk", qh, kh) / math.sqrt(D_HEAD)
    pm = jax.nn.softmax(s, axis=-1)
    a = jnp.einsum("bhqk,bhkd->bhqd", pm, vh)
    a = a.transpose(0, 2, 1, 3).reshape(B, S, D_MODEL)
    a = a @ p["wo"] + p["bo"]

    def ln(t, g, b):
        mu = t.mean(-1, keepdims=True)
        var = ((t - mu) ** 2).mean(-1, keepdims=True)
        return (t - mu) * jax.lax.rsqrt(var + EPS) * g + b

    y = ln(x + a, p["g1"], p["be1"])
    ff = jnp.maximum(y @ p["w1"] + p["b1"], 0.0) @ p["w2"] + p["b2"]
    return ln(y + ff, p["g2"], p["be2"])


# ----------------------------- main ----------------------------------------
if __name__ == "__main__":
    key = jax.random.PRNGKey(0)
    k_in, k_par = jax.random.split(key)
    tgt = jax.random.normal(k_in, (B, S, D_MODEL), jnp.float32)
    params = init_params(k_par)
    packed = pack_params(params)

    out = decoder_layer(tgt, packed)
    out = jax.block_until_ready(out)

    ref = decoder_layer_ref(tgt, params)
    assert out.shape == (B, S, D_MODEL)
    assert jnp.allclose(out, ref, rtol=1e-4, atol=1e-4), "mismatch vs reference"

    print("KERNEL_OK")
</pallas_src>

<mosaic_0001>
module attributes {stable_mosaic.version = 11 : i64} {
  func.func @decoder_layer_kernel(%arg0: i32, %arg1: memref<2x8x32xf32, #tpu.memory_space<vmem>>, %arg2: memref<32x576xf32, #tpu.memory_space<vmem>>, %arg3: memref<64x32xf32, #tpu.memory_space<vmem>>, %arg4: memref<12x288xf32, #tpu.memory_space<vmem>>, %arg5: memref<2x8x32xf32, #tpu.memory_space<vmem>>) attributes {dimension_semantics = [#tpu.dimension_semantics<parallel>], iteration_bounds = array<i64: 1>, scalar_prefetch = 0 : i64, scratch_operands = 0 : i64, tpu.core_type = #tpu.core_type<tc>, window_params = [{transform_indices = @transform_0, window_bounds = array<i64: 2, 8, 32>}, {pipeline_mode = #tpu.pipeline_mode<synchronous>, transform_indices = @transform_1, window_bounds = array<i64: 32, 576>}, {pipeline_mode = #tpu.pipeline_mode<synchronous>, transform_indices = @transform_2, window_bounds = array<i64: 64, 32>}, {pipeline_mode = #tpu.pipeline_mode<synchronous>, transform_indices = @transform_3, window_bounds = array<i64: 12, 288>}, {transform_indices = @transform_4, window_bounds = array<i64: 2, 8, 32>}]} {
    %c0 = arith.constant 0 : index
    %c0_0 = arith.constant 0 : index
    %c0_1 = arith.constant 0 : index
    %0 = vector.load %arg1[%c0, %c0_0, %c0_1] : memref<2x8x32xf32, #tpu.memory_space<vmem>>, vector<2x8x32xf32>
    %1 = vector.shape_cast %0 : vector<2x8x32xf32> to vector<16x32xf32>
    %c0_2 = arith.constant 0 : index
    %c0_3 = arith.constant 0 : index
    %2 = vector.load %arg4[%c0_2, %c0_3] : memref<12x288xf32, #tpu.memory_space<vmem>>, vector<12x288xf32>
    %3 = vector.extract_strided_slice %2 {offsets = [0, 0], sizes = [1, 288], strides = [1, 1]} : vector<12x288xf32> to vector<1x288xf32>
    %4 = vector.extract_strided_slice %2 {offsets = [1, 0], sizes = [1, 32], strides = [1, 1]} : vector<12x288xf32> to vector<1x32xf32>
    %5 = vector.extract_strided_slice %2 {offsets = [2, 0], sizes = [1, 64], strides = [1, 1]} : vector<12x288xf32> to vector<1x64xf32>
    %6 = vector.extract_strided_slice %2 {offsets = [3, 0], sizes = [1, 32], strides = [1, 1]} : vector<12x288xf32> to vector<1x32xf32>
    %7 = vector.extract_strided_slice %2 {offsets = [4, 0], sizes = [1, 32], strides = [1, 1]} : vector<12x288xf32> to vector<1x32xf32>
    %8 = vector.extract_strided_slice %2 {offsets = [5, 0], sizes = [1, 32], strides = [1, 1]} : vector<12x288xf32> to vector<1x32xf32>
    %9 = vector.extract_strided_slice %2 {offsets = [6, 0], sizes = [1, 32], strides = [1, 1]} : vector<12x288xf32> to vector<1x32xf32>
    %10 = vector.extract_strided_slice %2 {offsets = [7, 0], sizes = [1, 32], strides = [1, 1]} : vector<12x288xf32> to vector<1x32xf32>
    %c0_4 = arith.constant 0 : index
    %c0_5 = arith.constant 0 : index
    %11 = vector.load %arg2[%c0_4, %c0_5] : memref<32x576xf32, #tpu.memory_space<vmem>>, vector<32x288xf32>
    %cst = arith.constant dense<0.000000e+00> : vector<16x288xf32>
    %12 = tpu.matmul %1, %11, %cst {dimension_numbers = #tpu.dot_dimension_numbers<[1], [0], [0], [1], [0, 0, 1, 1], [], []>} : vector<16x32xf32>, vector<32x288xf32>, vector<16x288xf32> -> vector<16x288xf32>
    %13 = vector.broadcast %3 : vector<1x288xf32> to vector<16x288xf32>
    %14 = arith.addf %12, %13 : vector<16x288xf32>
    %15 = vector.extract_strided_slice %14 {offsets = [0, 0], sizes = [16, 32], strides = [1, 1]} : vector<16x288xf32> to vector<16x32xf32>
    %16 = vector.shape_cast %15 : vector<16x32xf32> to vector<2x8x32xf32>
    %17 = vector.extract_strided_slice %14 {offsets = [0, 128], sizes = [16, 32], strides = [1, 1]} : vector<16x288xf32> to vector<16x32xf32>
    %18 = vector.shape_cast %17 : vector<16x32xf32> to vector<2x8x32xf32>
    %19 = vector.extract_strided_slice %14 {offsets = [0, 256], sizes = [16, 32], strides = [1, 1]} : vector<16x288xf32> to vector<16x32xf32>
    %20 = vector.shape_cast %19 : vector<16x32xf32> to vector<2x8x32xf32>
    %cst_6 = arith.constant 0.000000e+00 : f32
    %21 = vector.broadcast %cst_6 : f32 to vector<2x8x32xf32>
    %22 = vector.extract_strided_slice %2 {offsets = [8, 0], sizes = [1, 32], strides = [1, 1]} : vector<12x288xf32> to vector<1x32xf32>
    %23 = vector.shape_cast %22 : vector<1x32xf32> to vector<1x1x32xf32>
    %24 = vector.broadcast %23 : vector<1x1x32xf32> to vector<2x8x32xf32>
    %25 = arith.mulf %18, %24 : vector<2x8x32xf32>
    "tpu.trace_start"() <{level = 10 : i32, message = "bqd,bkd->bqk"}> : () -> ()
    %cst_7 = arith.constant dense<0.000000e+00> : vector<2x8x8xf32>
    %26 = tpu.matmul %16, %25, %cst_7 {dimension_numbers = #tpu.dot_dimension_numbers<[2], [2], [1], [1], [0, 0, 0, 1, 1, 1], [0], [0]>} : vector<2x8x32xf32>, vector<2x8x32xf32>, vector<2x8x8xf32> -> vector<2x8x8xf32>
    "tpu.trace_stop"() : () -> ()
    %cst_8 = arith.constant dense<0xFF800000> : vector<2x8xf32>
    %27 = vector.multi_reduction <maximumf>, %26, %cst_8 [2] : vector<2x8x8xf32> to vector<2x8xf32>
    %28 = vector.shape_cast %27 : vector<2x8xf32> to vector<2x8x1xf32>
    %29 = vector.broadcast %28 : vector<2x8x1xf32> to vector<2x8x8xf32>
    %30 = arith.subf %26, %29 : vector<2x8x8xf32>
    %31 = math.exp %30 : vector<2x8x8xf32>
    %cst_9 = arith.constant dense<0.000000e+00> : vector<2x8xf32>
    %32 = vector.multi_reduction <add>, %31, %cst_9 [2] : vector<2x8x8xf32> to vector<2x8xf32>
    %33 = vector.shape_cast %32 : vector<2x8xf32> to vector<2x8x1xf32>
    %34 = vector.broadcast %33 : vector<2x8x1xf32> to vector<2x8x8xf32>
    %35 = arith.divf %31, %34 : vector<2x8x8xf32>
    "tpu.trace_start"() <{level = 10 : i32, message = "bqk,bkd->bqd"}> : () -> ()
    %cst_10 = arith.constant dense<0.000000e+00> : vector<2x8x32xf32>
    %36 = tpu.matmul %35, %20, %cst_10 {dimension_numbers = #tpu.dot_dimension_numbers<[2], [1], [1], [2], [0, 0, 0, 1, 1, 2], [0], [0]>} : vector<2x8x8xf32>, vector<2x8x32xf32>, vector<2x8x32xf32> -> vector<2x8x32xf32>
    "tpu.trace_stop"() : () -> ()
    %37 = vector.broadcast %23 : vector<1x1x32xf32> to vector<2x8x32xf32>
    %38 = arith.mulf %36, %37 : vector<2x8x32xf32>
    %39 = arith.addf %21, %38 : vector<2x8x32xf32>
    %40 = vector.extract_strided_slice %2 {offsets = [9, 0], sizes = [1, 32], strides = [1, 1]} : vector<12x288xf32> to vector<1x32xf32>
    %41 = vector.shape_cast %40 : vector<1x32xf32> to vector<1x1x32xf32>
    %42 = vector.broadcast %41 : vector<1x1x32xf32> to vector<2x8x32xf32>
    %43 = arith.mulf %18, %42 : vector<2x8x32xf32>
    "tpu.trace_start"() <{level = 10 : i32, message = "bqd,bkd->bqk"}> : () -> ()
    %cst_11 = arith.constant dense<0.000000e+00> : vector<2x8x8xf32>
    %44 = tpu.matmul %16, %43, %cst_11 {dimension_numbers = #tpu.dot_dimension_numbers<[2], [2], [1], [1], [0, 0, 0, 1, 1, 1], [0], [0]>} : vector<2x8x32xf32>, vector<2x8x32xf32>, vector<2x8x8xf32> -> vector<2x8x8xf32>
    "tpu.trace_stop"() : () -> ()
    %cst_12 = arith.constant dense<0xFF800000> : vector<2x8xf32>
    %45 = vector.multi_reduction <maximumf>, %44, %cst_12 [2] : vector<2x8x8xf32> to vector<2x8xf32>
    %46 = vector.shape_cast %45 : vector<2x8xf32> to vector<2x8x1xf32>
    %47 = vector.broadcast %46 : vector<2x8x1xf32> to vector<2x8x8xf32>
    %48 = arith.subf %44, %47 : vector<2x8x8xf32>
    %49 = math.exp %48 : vector<2x8x8xf32>
    %cst_13 = arith.constant dense<0.000000e+00> : vector<2x8xf32>
    %50 = vector.multi_reduction <add>, %49, %cst_13 [2] : vector<2x8x8xf32> to vector<2x8xf32>
    %51 = vector.shape_cast %50 : vector<2x8xf32> to vector<2x8x1xf32>
    %52 = vector.broadcast %51 : vector<2x8x1xf32> to vector<2x8x8xf32>
    %53 = arith.divf %49, %52 : vector<2x8x8xf32>
    "tpu.trace_start"() <{level = 10 : i32, message = "bqk,bkd->bqd"}> : () -> ()
    %cst_14 = arith.constant dense<0.000000e+00> : vector<2x8x32xf32>
    %54 = tpu.matmul %53, %20, %cst_14 {dimension_numbers = #tpu.dot_dimension_numbers<[2], [1], [1], [2], [0, 0, 0, 1, 1, 2], [0], [0]>} : vector<2x8x8xf32>, vector<2x8x32xf32>, vector<2x8x32xf32> -> vector<2x8x32xf32>
    "tpu.trace_stop"() : () -> ()
    %55 = vector.broadcast %41 : vector<1x1x32xf32> to vector<2x8x32xf32>
    %56 = arith.mulf %54, %55 : vector<2x8x32xf32>
    %57 = arith.addf %39, %56 : vector<2x8x32xf32>
    %58 = vector.extract_strided_slice %2 {offsets = [10, 0], sizes = [1, 32], strides = [1, 1]} : vector<12x288xf32> to vector<1x32xf32>
    %59 = vector.shape_cast %58 : vector<1x32xf32> to vector<1x1x32xf32>
    %60 = vector.broadcast %59 : vector<1x1x32xf32> to vector<2x8x32xf32>
    %61 = arith.mulf %18, %60 : vector<2x8x32xf32>
    "tpu.trace_start"() <{level = 10 : i32, message = "bqd,bkd->bqk"}> : () -> ()
    %cst_15 = arith.constant dense<0.000000e+00> : vector<2x8x8xf32>
    %62 = tpu.matmul %16, %61, %cst_15 {dimension_numbers = #tpu.dot_dimension_numbers<[2], [2], [1], [1], [0, 0, 0, 1, 1, 1], [0], [0]>} : vector<2x8x32xf32>, vector<2x8x32xf32>, vector<2x8x8xf32> -> vector<2x8x8xf32>
    "tpu.trace_stop"() : () -> ()
    %cst_16 = arith.constant dense<0xFF800000> : vector<2x8xf32>
    %63 = vector.multi_reduction <maximumf>, %62, %cst_16 [2] : vector<2x8x8xf32> to vector<2x8xf32>
    %64 = vector.shape_cast %63 : vector<2x8xf32> to vector<2x8x1xf32>
    %65 = vector.broadcast %64 : vector<2x8x1xf32> to vector<2x8x8xf32>
    %66 = arith.subf %62, %65 : vector<2x8x8xf32>
    %67 = math.exp %66 : vector<2x8x8xf32>
    %cst_17 = arith.constant dense<0.000000e+00> : vector<2x8xf32>
    %68 = vector.multi_reduction <add>, %67, %cst_17 [2] : vector<2x8x8xf32> to vector<2x8xf32>
    %69 = vector.shape_cast %68 : vector<2x8xf32> to vector<2x8x1xf32>
    %70 = vector.broadcast %69 : vector<2x8x1xf32> to vector<2x8x8xf32>
    %71 = arith.divf %67, %70 : vector<2x8x8xf32>
    "tpu.trace_start"() <{level = 10 : i32, message = "bqk,bkd->bqd"}> : () -> ()
    %cst_18 = arith.constant dense<0.000000e+00> : vector<2x8x32xf32>
    %72 = tpu.matmul %71, %20, %cst_18 {dimension_numbers = #tpu.dot_dimension_numbers<[2], [1], [1], [2], [0, 0, 0, 1, 1, 2], [0], [0]>} : vector<2x8x8xf32>, vector<2x8x32xf32>, vector<2x8x32xf32> -> vector<2x8x32xf32>
    "tpu.trace_stop"() : () -> ()
    %73 = vector.broadcast %59 : vector<1x1x32xf32> to vector<2x8x32xf32>
    %74 = arith.mulf %72, %73 : vector<2x8x32xf32>
    %75 = arith.addf %57, %74 : vector<2x8x32xf32>
    %76 = vector.extract_strided_slice %2 {offsets = [11, 0], sizes = [1, 32], strides = [1, 1]} : vector<12x288xf32> to vector<1x32xf32>
    %77 = vector.shape_cast %76 : vector<1x32xf32> to vector<1x1x32xf32>
    %78 = vector.broadcast %77 : vector<1x1x32xf32> to vector<2x8x32xf32>
    %79 = arith.mulf %18, %78 : vector<2x8x32xf32>
    "tpu.trace_start"() <{level = 10 : i32, message = "bqd,bkd->bqk"}> : () -> ()
    %cst_19 = arith.constant dense<0.000000e+00> : vector<2x8x8xf32>
    %80 = tpu.matmul %16, %79, %cst_19 {dimension_numbers = #tpu.dot_dimension_numbers<[2], [2], [1], [1], [0, 0, 0, 1, 1, 1], [0], [0]>} : vector<2x8x32xf32>, vector<2x8x32xf32>, vector<2x8x8xf32> -> vector<2x8x8xf32>
    "tpu.trace_stop"() : () -> ()
    %cst_20 = arith.constant dense<0xFF800000> : vector<2x8xf32>
    %81 = vector.multi_reduction <maximumf>, %80, %cst_20 [2] : vector<2x8x8xf32> to vector<2x8xf32>
    %82 = vector.shape_cast %81 : vector<2x8xf32> to vector<2x8x1xf32>
    %83 = vector.broadcast %82 : vector<2x8x1xf32> to vector<2x8x8xf32>
    %84 = arith.subf %80, %83 : vector<2x8x8xf32>
    %85 = math.exp %84 : vector<2x8x8xf32>
    %cst_21 = arith.constant dense<0.000000e+00> : vector<2x8xf32>
    %86 = vector.multi_reduction <add>, %85, %cst_21 [2] : vector<2x8x8xf32> to vector<2x8xf32>
    %87 = vector.shape_cast %86 : vector<2x8xf32> to vector<2x8x1xf32>
    %88 = vector.broadcast %87 : vector<2x8x1xf32> to vector<2x8x8xf32>
    %89 = arith.divf %85, %88 : vector<2x8x8xf32>
    "tpu.trace_start"() <{level = 10 : i32, message = "bqk,bkd->bqd"}> : () -> ()
    %cst_22 = arith.constant dense<0.000000e+00> : vector<2x8x32xf32>
    %90 = tpu.matmul %89, %20, %cst_22 {dimension_numbers = #tpu.dot_dimension_numbers<[2], [1], [1], [2], [0, 0, 0, 1, 1, 2], [0], [0]>} : vector<2x8x8xf32>, vector<2x8x32xf32>, vector<2x8x32xf32> -> vector<2x8x32xf32>
    "tpu.trace_stop"() : () -> ()
    %91 = vector.broadcast %77 : vector<1x1x32xf32> to vector<2x8x32xf32>
    %92 = arith.mulf %90, %91 : vector<2x8x32xf32>
    %93 = arith.addf %75, %92 : vector<2x8x32xf32>
    %c0_23 = arith.constant 0 : index
    %c384 = arith.constant 384 : index
    %94 = vector.load %arg2[%c0_23, %c384] : memref<32x576xf32, #tpu.memory_space<vmem>>, vector<32x32xf32>
    %95 = vector.shape_cast %93 : vector<2x8x32xf32> to vector<16x32xf32>
    %cst_24 = arith.constant dense<0.000000e+00> : vector<16x32xf32>
    %96 = tpu.matmul %95, %94, %cst_24 {dimension_numbers = #tpu.dot_dimension_numbers<[1], [0], [0], [1], [0, 0, 1, 1], [], []>} : vector<16x32xf32>, vector<32x32xf32>, vector<16x32xf32> -> vector<16x32xf32>
    %97 = vector.broadcast %4 : vector<1x32xf32> to vector<16x32xf32>
    %98 = arith.addf %96, %97 : vector<16x32xf32>
    %99 = arith.addf %1, %98 : vector<16x32xf32>
    %cst_25 = arith.constant dense<0.000000e+00> : vector<16xf32>
    %100 = vector.multi_reduction <add>, %99, %cst_25 [1] : vector<16x32xf32> to vector<16xf32>
    %101 = vector.shape_cast %100 : vector<16xf32> to vector<16x1xf32>
    %cst_26 = arith.constant 3.200000e+01 : f32
    %102 = vector.broadcast %cst_26 : f32 to vector<16x1xf32>
    %103 = arith.divf %101, %102 : vector<16x1xf32>
    %104 = vector.broadcast %103 : vector<16x1xf32> to vector<16x32xf32>
    %105 = arith.subf %99, %104 : vector<16x32xf32>
    %106 = arith.mulf %105, %105 : vector<16x32xf32>
    %cst_27 = arith.constant dense<0.000000e+00> : vector<16xf32>
    %107 = vector.multi_reduction <add>, %106, %cst_27 [1] : vector<16x32xf32> to vector<16xf32>
    %108 = vector.shape_cast %107 : vector<16xf32> to vector<16x1xf32>
    %cst_28 = arith.constant 3.200000e+01 : f32
    %109 = vector.broadcast %cst_28 : f32 to vector<16x1xf32>
    %110 = arith.divf %108, %109 : vector<16x1xf32>
    %111 = vector.broadcast %103 : vector<16x1xf32> to vector<16x32xf32>
    %112 = arith.subf %99, %111 : vector<16x32xf32>
    %cst_29 = arith.constant 9.99999974E-6 : f32
    %113 = vector.broadcast %cst_29 : f32 to vector<16x1xf32>
    %114 = arith.addf %110, %113 : vector<16x1xf32>
    %115 = math.rsqrt %114 : vector<16x1xf32>
    %116 = vector.broadcast %115 : vector<16x1xf32> to vector<16x32xf32>
    %117 = arith.mulf %112, %116 : vector<16x32xf32>
    %118 = vector.broadcast %7 : vector<1x32xf32> to vector<16x32xf32>
    %119 = arith.mulf %117, %118 : vector<16x32xf32>
    %120 = vector.broadcast %8 : vector<1x32xf32> to vector<16x32xf32>
    %121 = arith.addf %119, %120 : vector<16x32xf32>
    %c0_30 = arith.constant 0 : index
    %c512 = arith.constant 512 : index
    %122 = vector.load %arg2[%c0_30, %c512] : memref<32x576xf32, #tpu.memory_space<vmem>>, vector<32x64xf32>
    %cst_31 = arith.constant dense<0.000000e+00> : vector<16x64xf32>
    %123 = tpu.matmul %121, %122, %cst_31 {dimension_numbers = #tpu.dot_dimension_numbers<[1], [0], [0], [1], [0, 0, 1, 1], [], []>} : vector<16x32xf32>, vector<32x64xf32>, vector<16x64xf32> -> vector<16x64xf32>
    %124 = vector.broadcast %5 : vector<1x64xf32> to vector<16x64xf32>
    %125 = arith.addf %123, %124 : vector<16x64xf32>
    %cst_32 = arith.constant 0.000000e+00 : f32
    %126 = vector.broadcast %cst_32 : f32 to vector<16x64xf32>
    %127 = arith.maximumf %125, %126 : vector<16x64xf32>
    %c0_33 = arith.constant 0 : index
    %c0_34 = arith.constant 0 : index
    %128 = vector.load %arg3[%c0_33, %c0_34] : memref<64x32xf32, #tpu.memory_space<vmem>>, vector<64x32xf32>
    %cst_35 = arith.constant dense<0.000000e+00> : vector<16x32xf32>
    %129 = tpu.matmul %127, %128, %cst_35 {dimension_numbers = #tpu.dot_dimension_numbers<[1], [0], [0], [1], [0, 0, 1, 1], [], []>} : vector<16x64xf32>, vector<64x32xf32>, vector<16x32xf32> -> vector<16x32xf32>
    %130 = vector.broadcast %6 : vector<1x32xf32> to vector<16x32xf32>
    %131 = arith.addf %129, %130 : vector<16x32xf32>
    %132 = arith.addf %121, %131 : vector<16x32xf32>
    %cst_36 = arith.constant dense<0.000000e+00> : vector<16xf32>
    %133 = vector.multi_reduction <add>, %132, %cst_36 [1] : vector<16x32xf32> to vector<16xf32>
    %134 = vector.shape_cast %133 : vector<16xf32> to vector<16x1xf32>
    %cst_37 = arith.constant 3.200000e+01 : f32
    %135 = vector.broadcast %cst_37 : f32 to vector<16x1xf32>
    %136 = arith.divf %134, %135 : vector<16x1xf32>
    %137 = vector.broadcast %136 : vector<16x1xf32> to vector<16x32xf32>
    %138 = arith.subf %132, %137 : vector<16x32xf32>
    %139 = arith.mulf %138, %138 : vector<16x32xf32>
    %cst_38 = arith.constant dense<0.000000e+00> : vector<16xf32>
    %140 = vector.multi_reduction <add>, %139, %cst_38 [1] : vector<16x32xf32> to vector<16xf32>
    %141 = vector.shape_cast %140 : vector<16xf32> to vector<16x1xf32>
    %cst_39 = arith.constant 3.200000e+01 : f32
    %142 = vector.broadcast %cst_39 : f32 to vector<16x1xf32>
    %143 = arith.divf %141, %142 : vector<16x1xf32>
    %144 = vector.broadcast %136 : vector<16x1xf32> to vector<16x32xf32>
    %145 = arith.subf %132, %144 : vector<16x32xf32>
    %cst_40 = arith.constant 9.99999974E-6 : f32
    %146 = vector.broadcast %cst_40 : f32 to vector<16x1xf32>
    %147 = arith.addf %143, %146 : vector<16x1xf32>
    %148 = math.rsqrt %147 : vector<16x1xf32>
    %149 = vector.broadcast %148 : vector<16x1xf32> to vector<16x32xf32>
    %150 = arith.mulf %145, %149 : vector<16x32xf32>
    %151 = vector.broadcast %9 : vector<1x32xf32> to vector<16x32xf32>
    %152 = arith.mulf %150, %151 : vector<16x32xf32>
    %153 = vector.broadcast %10 : vector<1x32xf32> to vector<16x32xf32>
    %154 = arith.addf %152, %153 : vector<16x32xf32>
    %155 = vector.shape_cast %154 : vector<16x32xf32> to vector<2x8x32xf32>
    %c0_41 = arith.constant 0 : index
    %c0_42 = arith.constant 0 : index
    %c0_43 = arith.constant 0 : index
    %156 = vector.load %arg5[%c0_41, %c0_42, %c0_43] : memref<2x8x32xf32, #tpu.memory_space<vmem>>, vector<2x8x32xf32>
    tpu.vector_store %arg5[%c0_41, %c0_42, %c0_43], %155 {strides = array<i32>} : memref<2x8x32xf32, #tpu.memory_space<vmem>>, vector<2x8x32xf32>,
    return
  }
  func.func @transform_0(%arg0: i32) -> (i32, i32, i32) {
    %c0_i32 = arith.constant 0 : i32
    %c0_i32_0 = arith.constant 0 : i32
    %c0_i32_1 = arith.constant 0 : i32
    return %arg0, %c0_i32, %c0_i32_0 : i32, i32, i32
  }
  func.func @transform_1(%arg0: i32) -> (i32, i32) {
    %c0_i32 = arith.constant 0 : i32
    %c0_i32_0 = arith.constant 0 : i32
    %c0_i32_1 = arith.constant 0 : i32
    return %c0_i32, %c0_i32_0 : i32, i32
  }
  func.func @transform_2(%arg0: i32) -> (i32, i32) {
    %c0_i32 = arith.constant 0 : i32
    %c0_i32_0 = arith.constant 0 : i32
    %c0_i32_1 = arith.constant 0 : i32
    return %c0_i32, %c0_i32_0 : i32, i32
  }
  func.func @transform_3(%arg0: i32) -> (i32, i32) {
    %c0_i32 = arith.constant 0 : i32
    %c0_i32_0 = arith.constant 0 : i32
    %c0_i32_1 = arith.constant 0 : i32
    return %c0_i32, %c0_i32_0 : i32, i32
  }
  func.func @transform_4(%arg0: i32) -> (i32, i32, i32) {
    %c0_i32 = arith.constant 0 : i32
    %c0_i32_0 = arith.constant 0 : i32
    %c0_i32_1 = arith.constant 0 : i32
    return %arg0, %c0_i32, %c0_i32_0 : i32, i32, i32
  }
}

</mosaic_0001>

<bundles_post_ra>
// kernel: _decoder_layer_call.1
= control target key start
LH: loop header
LB: loop body
LE: loop exit
PB: predicated region body
PF: predicated region fallthrough
CT: control target
= control target key end

     0   :  { %9 = vsyncpa [#allocation3], 0  ;;  %s2583_s0 = inlined_call_operand.vmem [shape: f32[2,8,32], index: 0, kind: input, shape index: {}]   ;;  %s2584_s1 = inlined_call_operand.hbm [shape: f32[32,576], index: 1, kind: input, shape index: {}]   ;;  %s2585_s2 = inlined_call_operand.vmem [shape: f32[64,32], index: 2, kind: input, shape index: {}]   ;;  %s2586_s3 = inlined_call_operand.vmem [shape: f32[12,288], index: 3, kind: input, shape index: {}]   ;;  %s2587_s4 = inlined_call_operand.hbm [shape: f32[2,8,32], index: 4, kind: output, shape index: {}]  }
   0x1   :  { %10 = vsyncpa [#allocation4], 0  ;;  %s2268_s15 = smov [#allocation2]   ;;  %s2220_s19 = scalar_lea.hbm %s2584_s1, 2560 }
   0x2   :  { %s18_s16 = sshll.u32 %s2268_s15, 4  ;;  %p2221_p0 = scmp.ne.s32.totalorder %s2584_s1, %s2220_s19  ;;  %s19_s16 = int_to_ptr.vmem [resolvable:$true] %s18_s16 }
   0x3   :  { %p2224_p1 = scmp.lt.u32.totalorder %s2220_s19, %s2584_s1 }
   0x5   :  { %p2226_p2 = pnand %p2224_p1, %p2221_p0 }
   0x7   :  { %2229 = shalt.err (!%p2226_p2)
}
   0x8   :  { %s2230_s24 = scalar_lea.vmem %s19_s16, 2560  ;;  %p2235_p4 = scmp.lt.s32.totalorder %s19_s16, %s19_s16 }
   0x9   :  { %p2231_p3 = scmp.ne.s32.totalorder %s19_s16, %s2230_s24  ;;  %p2236_p5 = scmp.lt.s32.totalorder %s2230_s24, %s2230_s24 }
   0xb   :  { %p2237_p6 = por %p2236_p5, %p2235_p4 }
   0xd   :  { %p2238_p7 = pnand %p2237_p6, %p2231_p3 }
   0xf   :  { %2241 = shalt.err (!%p2238_p7)
}
  0x10   :  { %s2269_s25 = smov 640   ;;  %s2270_s26 = smov 40  }
  0x11   :  { %24 = dma.hbm_to_vmem [thread:$0]  %s2584_s1, 2560, %s19_s16, [#allocation3], %s2269_s25, %s2269_s25, %s2270_s26  }
  0x12   :  { %2264 = dma.done.wait [#allocation3], 2560  }
  0x13   :  { %2265 = vsyncadd [#allocation3], 4294964736  ;;  %v2271_v0 = vmov 0.0   ;;  %v39_v1 = vld [vmem:[#allocation2 + $0x8] sm:$0xff]  ;;  %v42_v2 = vld [vmem:[#allocation2 + $0x30] sm:$0xff]  ;;  %vm62_vm0 = vcmask 261120   ;;  %v50_v21 = vlaneseq }
  0x14   :  { %133 = vmatprep.mubr.f32.mxu0 %v2271_v0  ;;  %2003 = vmatprep.subr.mxu1 %v2271_v0  ;;  %v38_v3 = vld [vmem:[#allocation2] sm:$0xff]  ;;  %v2124_v4 = vpack.c.bf16 %v42_v2, %v39_v1  ;;  %v41_v5 = vld [vmem:[#allocation2 + $0x28] sm:$0xff]  ;;  %v45_v6 = vld [vmem:[#allocation2 + $0x58] sm:$0xff]  ;;  %vm2272_vm1 = vmmov 0   ;;  %vm379_vm2 = vcmask 64512   ;;  %vm1757_vm3 = vcmask 523264  }
  0x15   :  { %v48_v7 = vld [vmem:[#allocation2 + $0x80] sm:$0xff]  ;;  %v2126_v8 = vpack.c.bf16 %v41_v5, %v38_v3  ;;  %v44_v10 = vld [vmem:[#allocation2 + $0x50] sm:$0xff]  ;;  %v47_v11 = vld [vmem:[#allocation2 + $0x78] sm:$0xff]  ;;  %2005 = vmatprep.mubr.msk.f32.mxu1 %vm2272_vm1, %v2271_v0  ;;  %v2339_v22 = vshrl.u32 %v50_v21, 7 }
  0x16   :  { %v2128_v9 = vpack.c.bf16 %v48_v7, %v45_v6  ;;  %2125 = vmatprep.subr.bf16.mxu0 %v2124_v4  ;;  %v40_v12 = vld [vmem:[#allocation2 + $0x10] sm:$0xff]  ;;  %v43_v13 = vld [vmem:[#allocation2 + $0x38] sm:$0xff]  ;;  %v2130_v14 = vpack.c.bf16 %v47_v11, %v44_v10  ;;  %v2318_v16 = vld [vmem:[%s2583_s0] sm:$0xff] }
  0x17   :  { %2127 = vmatpush1.bf16.msra.mxu0 %v2126_v8  ;;  %v2132_v15 = vpack.c.bf16 %v43_v13, %v40_v12  ;;  %v2326_v17 = vld [vmem:[%s2583_s0 + $0x8] sm:$0xff]  ;;  %v46_v18 = vld [vmem:[#allocation2 + $0x60] sm:$0xff]  ;;  %v52_v23 = vsub.s32 0, %v2339_v22  ;;  %v2348_v25 = vld [vmem:[%s2586_s3 + $0x18] sm:$0xf]  ;;  %v554_v1 = vsub.s32 1, %v2339_v22 }
  0x18   :  { %2129 = vmatprep.subr.bf16.mxu0 %v2128_v9  ;;  %v49_v19 = vld [vmem:[#allocation2 + $0x88] sm:$0xff]  ;;  %v2353_v27 = vld [vmem:[%s2586_s3] sm:$0xff]  ;;  %v36_v40 = vld [vmem:[%s2586_s3 + $0x10] sm:$0xff] }
  0x19   :  { %v2136_v20 = vpack.c.bf16 %v49_v19, %v46_v18  ;;  %v35_v24 = vld [vmem:[%s2586_s3 + $0x8] sm:$0xff]  ;;  %v2356_v29 = vrot.slane %v2348_v25, %v52_v23  ;;  %v53_v32 = vrot.slane %v2353_v27, %v52_v23  ;;  %v61_v41 = vrot.slane %v36_v40, %v52_v23 }
  0x1a   :  { %v57_v26 = vrot.slane %v35_v24, %v52_v23  ;;  %v2402_v2 = vrot.slane %v2348_v25, %v554_v1 }
  0x1b   :  { %2131 = vmatpush1.bf16.msra.mxu0 %v2130_v14 }
  0x1c   :  { %2133 = vmatprep.subr.bf16.mxu0 %v2132_v15 }
  0x1e   :  { %1898 = vmatmul.mubr.msk.f32.vlgmr.msra.gmra.mrb[0].mxu0 %vm62_vm0, %v2318_v16 }
  0x1f   :  { %139 = vmatprep.mubr.f32.mxu0 %v2271_v0  ;;  %2135 = vmatpush3.bf16.msra.mxu0 %v2132_v15 }
  0x20   :  { %2137 = vmatprep.subr.bf16.mxu0 %v2136_v20 }
  0x22   :  { %1899 = vmatmul.mubr.msk.f32.gmra.mrb[2].mxu0 %vm62_vm0, %v2326_v17 }
  0x23   :  { %2000 = vmatprep.mubr.msk.f32.mxu0 %vm62_vm0, %v2318_v16  ;;  %2139 = vmatpush3.bf16.msra.mxu0 %v2136_v20 }
  0x24   :  { %2008 = vmatprep.subr.mxu0 %v2271_v0 }
  0x26   :  { %2001 = vmatmul.mubr.msk.f32.vlgmr.msra.gmra.mrb[4].mxu0 %vm62_vm0, %v2326_v17 }
  0x27   :  { %2010 = vmatprep.mubr.msk.f32.mxu0 %vm2272_vm1, %v2271_v0 }
  0xf1   :  { %v135_v28 = vpop.f32.mrb[0].mxu0 }
  0xf2   :  { %v137_v30 = vpop.f32.mrb[1].mxu0  ;;  %v2366_v37 = vadd.f32 %v135_v28, %v53_v32 }
  0xf3   :  { %v2358_v31 = vadd.f32 %v137_v30, %v57_v26 }
  0xf5   :  { %v141_v33 = vpop.f32.mrb[2].mxu0  ;;  %v225_v34 = vmul.f32 %v2356_v29, %v2358_v31  ;;  %v556_v5 = vmul.f32 %v2402_v2, %v2358_v31 }
  0xf6   :  { %v143_v35 = vpop.f32.mrb[3].mxu0  ;;  %v2376_v39 = vadd.f32 %v141_v33, %v53_v32 }
  0xf7   :  { %v2363_v36 = vadd.f32 %v143_v35, %v57_v26  ;;  %2004 = vmatpush3.xpose.msk.msra.mxu1 %vm62_vm0, %v225_v34 }
  0xf8   :  { %2013 = vmatprep.subr.mxu1 %v2271_v0 }
  0xf9   :  { %v226_v38 = vmul.f32 %v2356_v29, %v2363_v36  ;;  %v2002_v42 = vpop.f32.mrb[4].mxu0  ;;  %v557_v8 = vmul.f32 %v2402_v2, %v2363_v36 }
  0xfa   :  { %2006 = vmatmul.mubr.msk.f32.vlgmr.msra.gmra.mrb[0].mxu1 %vm62_vm0, %v2366_v37  ;;  %v2386_v43 = vadd.f32 %v2002_v42, %v61_v41  ;;  %v212_v44 = vpop.f32.mrb[5].mxu0 }
  0xfb   :  { %2009 = vmatpush3.xpose.msk.msra.mxu0 %vm62_vm0, %v226_v38  ;;  %2015 = vmatprep.mubr.msk.f32.mxu1 %vm2272_vm1, %v2271_v0  ;;  %v2390_v45 = vadd.f32 %v212_v44, %v61_v41  ;;  %v878_v41 = vsub.s32 2, %v2339_v22 }
  0xfc   :  { %2018 = vmatprep.subr.mxu0 %v2271_v0 }
  0xfd   :  { %2014 = vmatpush3.msra.mxu1 %v2390_v45  ;;  %v2438_v42 = vrot.slane %v2348_v25, %v878_v41 }
  0xfe   :  { %2011 = vmatmul.mubr.msk.f32.vlgmr.msra.gmra.mrb[6].mxu0 %vm62_vm0, %v2376_v39  ;;  %2023 = vmatprep.subr.mxu1 %v2271_v0 }
  0xff   :  { %2020 = vmatprep.mubr.msk.f32.mxu0 %vm2272_vm1, %v2271_v0  ;;  %2019 = vmatpush3.msra.mxu0 %v2386_v43 }
 0x100   :  { %2028 = vmatprep.subr.mxu0 %v2271_v0 }
 0x1cd   :  { %v299_v46 = vpop.f32.mrb[0].mxu1 }
 0x1ce   :  { %v2007_v47 = vpop.f32.mrb[1].mxu1  ;;  %v380_v48 = vsel %vm379_vm2, %v299_v46, -inf }
 0x1cf   :  { %381 = vmax.xlane.f32.xlu0 %v380_v48  ;;  %v880_v47 = vmul.f32 %v2438_v42, %v2358_v31 }
 0x1d1   :  { %v375_v49 = vpop.f32.mrb[6].mxu0 }
 0x1d2   :  { %v2012_v50 = vpop.f32.mrb[7].mxu0  ;;  %v383_v51 = vsel %vm379_vm2, %v375_v49, -inf }
 0x1d3   :  { %384 = vmax.xlane.f32.xlu0 %v383_v51  ;;  %v881_v50 = vmul.f32 %v2438_v42, %v2363_v36 }
 0x25c   :  { %v382_v52 = vpop.xlane.xlu0 %381 }
 0x25d   :  { %v386_v53 = vsub.f32 %v299_v46, %v382_v52 }
 0x25f   :  { %v388_v54 = vmul.f32 1.442695, %v386_v53 }
 0x260   :  { %v385_v55 = vpop.xlane.xlu0 %384 }
 0x261   :  { %2180 = vpow2.f32 %v388_v54  ;;  %v387_v56 = vsub.f32 %v375_v49, %v385_v55 }
 0x263   :  { %v390_v57 = vmul.f32 1.442695, %v387_v56 }
 0x265   :  { %2182 = vpow2.f32 %v390_v57 }
 0x26b   :  { %v2181_v58 = vpop.eup %2180 }
 0x26c   :  { %v392_v59 = vsel %vm379_vm2, %v2181_v58, 0.0 }
 0x26d   :  { %393 = vadd.xlane.f32.xlu1 %v392_v59 }
 0x26f   :  { %v2183_v60 = vpop.eup %2182 }
 0x270   :  { %v395_v61 = vsel %vm379_vm2, %v2183_v60, 0.0 }
 0x271   :  { %396 = vadd.xlane.f32.xlu1 %v395_v61 }
 0x2fa   :  { %v394_v62 = vpop.xlane.xlu1 %393 }
 0x2fb   :  { %2184 = vrcp.f32 %v394_v62 }
 0x2fe   :  { %v397_v63 = vpop.xlane.xlu1 %396 }
 0x2ff   :  { %2186 = vrcp.f32 %v397_v63 }
 0x305   :  { %v2185_v3 = vpop.eup %2184 }
 0x306   :  { %v399_v4 = vmul.f32 %v2185_v3, %v2181_v58 }
 0x308   :  { %2016 = vmatmul.mubr.msk.f32.vlgmr.msra.gmra.mrb[2].mxu1 %vm379_vm2, %v399_v4 }
 0x309   :  { %v2187_v6 = vpop.eup %2186  ;;  %2024 = vmatpush3.xpose.msk.msra.mxu1 %vm62_vm0, %v556_v5  ;;  %2025 = vmatprep.mubr.msk.f32.mxu1 %vm2272_vm1, %v2271_v0 }
 0x30a   :  { %v401_v7 = vmul.f32 %v2187_v6, %v2183_v60  ;;  %2033 = vmatprep.subr.mxu1 %v2271_v0 }
 0x30c   :  { %2021 = vmatmul.mubr.msk.f32.vlgmr.msra.gmra.mrb[8].mxu0 %vm379_vm2, %v401_v7  ;;  %2026 = vmatmul.mubr.msk.f32.vlgmr.msra.gmra.mrb[4].mxu1 %vm62_vm0, %v2366_v37 }
 0x30d   :  { %2029 = vmatpush3.xpose.msk.msra.mxu0 %vm62_vm0, %v557_v8  ;;  %2034 = vmatpush3.msra.mxu1 %v2390_v45 }
 0x30e   :  { %2030 = vmatprep.mubr.msk.f32.mxu0 %vm2272_vm1, %v2271_v0  ;;  %2038 = vmatprep.subr.mxu0 %v2271_v0 }
 0x30f   :  { %2035 = vmatprep.mubr.msk.f32.mxu1 %vm2272_vm1, %v2271_v0  ;;  %2043 = vmatprep.subr.mxu1 %v2271_v0 }
 0x310   :  { %2031 = vmatmul.mubr.msk.f32.vlgmr.msra.gmra.mrb[10].mxu0 %vm62_vm0, %v2376_v39 }
 0x311   :  { %2039 = vmatpush3.msra.mxu0 %v2386_v43  ;;  %2040 = vmatprep.mubr.msk.f32.mxu0 %vm2272_vm1, %v2271_v0 }
 0x312   :  { %2048 = vmatprep.subr.mxu0 %v2271_v0 }
 0x3db   :  { %v471_v9 = vpop.f32.mrb[2].mxu1 }
 0x3dc   :  { %v2017_v10 = vpop.f32.mrb[3].mxu1  ;;  %v548_v52 = vmul.f32 %v471_v9, %v2356_v29 }
 0x3df   :  { %v544_v11 = vpop.f32.mrb[8].mxu0  ;;  %v627_v12 = vpop.f32.mrb[4].mxu1 }
 0x3e0   :  { %v2022_v13 = vpop.f32.mrb[9].mxu0  ;;  %v2027_v14 = vpop.f32.mrb[5].mxu1  ;;  %v704_v15 = vsel %vm379_vm2, %v627_v12, -inf  ;;  %v549_v58 = vmul.f32 %v544_v11, %v2356_v29 }
 0x3e1   :  { %705 = vmax.xlane.f32.xlu0 %v704_v15 }
 0x3e3   :  { %v700_v18 = vpop.f32.mrb[10].mxu0 }
 0x3e4   :  { %v2032_v19 = vpop.f32.mrb[11].mxu0  ;;  %v707_v20 = vsel %vm379_vm2, %v700_v18, -inf }
 0x3e5   :  { %708 = vmax.xlane.f32.xlu1 %v707_v20 }
 0x46e   :  { %v706_v21 = vpop.xlane.xlu0 %705 }
 0x46f   :  { %v710_v23 = vsub.f32 %v627_v12, %v706_v21 }
 0x471   :  { %v712_v24 = vmul.f32 1.442695, %v710_v23 }
 0x472   :  { %v709_v26 = vpop.xlane.xlu1 %708 }
 0x473   :  { %2188 = vpow2.f32 %v712_v24  ;;  %v711_v28 = vsub.f32 %v700_v18, %v709_v26  ;;  %v1202_v18 = vsub.s32 3, %v2339_v22 }
 0x475   :  { %v714_v30 = vmul.f32 1.442695, %v711_v28  ;;  %v2478_v19 = vrot.slane %v2348_v25, %v1202_v18 }
 0x477   :  { %2190 = vpow2.f32 %v714_v30  ;;  %v1204_v23 = vmul.f32 %v2478_v19, %v2358_v31  ;;  %v1205_v25 = vmul.f32 %v2478_v19, %v2363_v36 }
 0x47d   :  { %v2189_v32 = vpop.eup %2188 }
 0x47e   :  { %v716_v33 = vsel %vm379_vm2, %v2189_v32, 0.0 }
 0x47f   :  { %717 = vadd.xlane.f32.xlu0 %v716_v33 }
 0x481   :  { %v2191_v34 = vpop.eup %2190 }
 0x482   :  { %v719_v35 = vsel %vm379_vm2, %v2191_v34, 0.0 }
 0x483   :  { %720 = vadd.xlane.f32.xlu1 %v719_v35 }
 0x50c   :  { %v718_v38 = vpop.xlane.xlu0 %717 }
 0x50d   :  { %2192 = vrcp.f32 %v718_v38 }
 0x510   :  { %v721_v40 = vpop.xlane.xlu1 %720 }
 0x511   :  { %2194 = vrcp.f32 %v721_v40 }
 0x517   :  { %v2193_v44 = vpop.eup %2192 }
 0x518   :  { %v723_v46 = vmul.f32 %v2193_v44, %v2189_v32 }
 0x51a   :  { %2036 = vmatmul.mubr.msk.f32.vlgmr.msra.gmra.mrb[6].mxu1 %vm379_vm2, %v723_v46 }
 0x51b   :  { %v2195_v48 = vpop.eup %2194  ;;  %2044 = vmatpush3.xpose.msk.msra.mxu1 %vm62_vm0, %v880_v47  ;;  %2045 = vmatprep.mubr.msk.f32.mxu1 %vm2272_vm1, %v2271_v0 }
 0x51c   :  { %v725_v49 = vmul.f32 %v2195_v48, %v2191_v34  ;;  %2053 = vmatprep.subr.mxu1 %v2271_v0 }
 0x51e   :  { %2041 = vmatmul.mubr.msk.f32.vlgmr.msra.gmra.mrb[12].mxu0 %vm379_vm2, %v725_v49  ;;  %2046 = vmatmul.mubr.msk.f32.vlgmr.msra.gmra.mrb[8].mxu1 %vm62_vm0, %v2366_v37 }
 0x51f   :  { %2049 = vmatpush3.xpose.msk.msra.mxu0 %vm62_vm0, %v881_v50  ;;  %2054 = vmatpush3.msra.mxu1 %v2390_v45 }
 0x520   :  { %2050 = vmatprep.mubr.msk.f32.mxu0 %vm2272_vm1, %v2271_v0  ;;  %2058 = vmatprep.subr.mxu0 %v2271_v0 }
 0x521   :  { %2055 = vmatprep.mubr.msk.f32.mxu1 %vm2272_vm1, %v2271_v0  ;;  %2063 = vmatprep.subr.mxu1 %v2271_v0 }
 0x522   :  { %2051 = vmatmul.mubr.msk.f32.vlgmr.msra.gmra.mrb[14].mxu0 %vm62_vm0, %v2376_v39 }
 0x523   :  { %2059 = vmatpush3.msra.mxu0 %v2386_v43  ;;  %2060 = vmatprep.mubr.msk.f32.mxu0 %vm2272_vm1, %v2271_v0 }
 0x524   :  { %2068 = vmatprep.subr.mxu0 %v2271_v0 }
 0x5ed   :  { %v795_v51 = vpop.f32.mrb[6].mxu1 }
 0x5ee   :  { %v872_v53 = vmul.f32 %v795_v51, %v2402_v2  ;;  %v2037_v54 = vpop.f32.mrb[7].mxu1 }
 0x5f0   :  { %v874_v55 = vadd.f32 %v872_v53, %v548_v52 }
 0x5f1   :  { %v868_v56 = vpop.f32.mrb[12].mxu0  ;;  %v951_v57 = vpop.f32.mrb[8].mxu1 }
 0x5f2   :  { %v873_v59 = vmul.f32 %v868_v56, %v2402_v2  ;;  %v2042_v60 = vpop.f32.mrb[13].mxu0  ;;  %v2047_v61 = vpop.f32.mrb[9].mxu1  ;;  %v1028_v62 = vsel %vm379_vm2, %v951_v57, -inf }
 0x5f3   :  { %1029 = vmax.xlane.f32.xlu0 %v1028_v62  ;;  %v1525_v60 = vld [vmem:[#allocation2 + $0x40] sm:$0xff]  ;;  %v1526_v62 = vld [vmem:[#allocation2 + $0x68] sm:$0xff] }
 0x5f4   :  { %v875_v63 = vadd.f32 %v873_v59, %v549_v58  ;;  %v1524_v59 = vld [vmem:[#allocation2 + $0x18] sm:$0xff] }
 0x5f5   :  { %v1024_v3 = vpop.f32.mrb[14].mxu0  ;;  %v2140_v61 = vpack.c.bf16 %v1525_v60, %v1524_v59 }
 0x5f6   :  { %v2052_v4 = vpop.f32.mrb[15].mxu0  ;;  %v1031_v5 = vsel %vm379_vm2, %v1024_v3, -inf }
 0x5f7   :  { %1032 = vmax.xlane.f32.xlu1 %v1031_v5 }
 0x680   :  { %v1030_v6 = vpop.xlane.xlu0 %1029 }
 0x681   :  { %v1034_v7 = vsub.f32 %v951_v57, %v1030_v6 }
 0x683   :  { %v1036_v8 = vmul.f32 1.442695, %v1034_v7 }
 0x684   :  { %v1033_v9 = vpop.xlane.xlu1 %1032 }
 0x685   :  { %2196 = vpow2.f32 %v1036_v8  ;;  %v1035_v10 = vsub.f32 %v1024_v3, %v1033_v9 }
 0x687   :  { %v1038_v29 = vmul.f32 1.442695, %v1035_v10 }
 0x689   :  { %2198 = vpow2.f32 %v1038_v29 }
 0x68f   :  { %v2197_v2 = vpop.eup %2196 }
 0x690   :  { %v1040_v11 = vsel %vm379_vm2, %v2197_v2, 0.0 }
 0x691   :  { %1041 = vadd.xlane.f32.xlu0 %v1040_v11 }
 0x693   :  { %v2199_v12 = vpop.eup %2198 }
 0x694   :  { %v1043_v13 = vsel %vm379_vm2, %v2199_v12, 0.0 }
 0x695   :  { %1044 = vadd.xlane.f32.xlu1 %v1043_v13 }
 0x71e   :  { %v1042_v14 = vpop.xlane.xlu0 %1041 }
 0x71f   :  { %2200 = vrcp.f32 %v1042_v14 }
 0x722   :  { %v1045_v15 = vpop.xlane.xlu1 %1044 }
 0x723   :  { %2202 = vrcp.f32 %v1045_v15 }
 0x729   :  { %v2201_v20 = vpop.eup %2200 }
 0x72a   :  { %v1047_v21 = vmul.f32 %v2201_v20, %v2197_v2  ;;  %v1531_v2 = vrot.slane %v2353_v27, %v554_v1 }
 0x72c   :  { %2056 = vmatmul.mubr.msk.f32.vlgmr.msra.gmra.mrb[10].mxu1 %vm379_vm2, %v1047_v21 }
 0x72d   :  { %v2203_v24 = vpop.eup %2202  ;;  %2064 = vmatpush3.xpose.msk.msra.mxu1 %vm62_vm0, %v1204_v23  ;;  %2065 = vmatprep.mubr.msk.f32.mxu1 %vm2272_vm1, %v2271_v0 }
 0x72e   :  { %v1049_v26 = vmul.f32 %v2203_v24, %v2199_v12  ;;  %2073 = vmatprep.subr.mxu1 %v2271_v0 }
 0x730   :  { %2061 = vmatmul.mubr.msk.f32.vlgmr.msra.gmra.mrb[16].mxu0 %vm379_vm2, %v1049_v26  ;;  %2066 = vmatmul.mubr.msk.f32.vlgmr.msra.gmra.mrb[12].mxu1 %vm62_vm0, %v2366_v37 }
 0x731   :  { %2069 = vmatpush3.xpose.msk.msra.mxu0 %vm62_vm0, %v1205_v25  ;;  %2074 = vmatpush3.msra.mxu1 %v2390_v45 }
 0x732   :  { %2070 = vmatprep.mubr.msk.f32.mxu0 %vm2272_vm1, %v2271_v0  ;;  %2078 = vmatprep.subr.mxu0 %v2271_v0 }
 0x733   :  { %2075 = vmatprep.mubr.msk.f32.mxu1 %vm2272_vm1, %v2271_v0  ;;  %2141 = vmatprep.subr.bf16.mxu1 %v2140_v61 }
 0x734   :  { %2071 = vmatmul.mubr.msk.f32.vlgmr.msra.gmra.mrb[18].mxu0 %vm62_vm0, %v2376_v39 }
 0x735   :  { %2079 = vmatpush3.msra.mxu0 %v2386_v43  ;;  %2080 = vmatprep.mubr.msk.f32.mxu0 %vm2272_vm1, %v2271_v0 }
 0x7ff   :  { %v1119_v31 = vpop.f32.mrb[10].mxu1 }
 0x800   :  { %v1196_v36 = vmul.f32 %v1119_v31, %v2438_v42  ;;  %v2057_v37 = vpop.f32.mrb[11].mxu1 }
 0x802   :  { %v1198_v45 = vadd.f32 %v1196_v36, %v874_v55 }
 0x803   :  { %v1192_v28 = vpop.f32.mrb[16].mxu0  ;;  %v1275_v30 = vpop.f32.mrb[12].mxu1 }
 0x804   :  { %v1197_v32 = vmul.f32 %v1192_v28, %v2438_v42  ;;  %v2062_v33 = vpop.f32.mrb[17].mxu0  ;;  %v2067_v34 = vpop.f32.mrb[13].mxu1  ;;  %v1352_v35 = vsel %vm379_vm2, %v1275_v30, -inf  ;;  %v1655_v28 = vld [vmem:[#allocation2 + $0x48] sm:$0xff] }
 0x805   :  { %1353 = vmax.xlane.f32.xlu0 %v1352_v35  ;;  %v1657_v33 = vld [vmem:[#allocation2 + $0x98] sm:$0xff]  ;;  %v1745_v35 = vld [vmem:[%s2585_s2] sm:$0xff] }
 0x806   :  { %v1199_v39 = vadd.f32 %v1197_v32, %v875_v63  ;;  %v1527_v63 = vld [vmem:[#allocation2 + $0x90] sm:$0xff] }
 0x807   :  { %v1348_v38 = vpop.f32.mrb[18].mxu0  ;;  %v2144_v3 = vpack.c.bf16 %v1527_v63, %v1526_v62  ;;  %v1656_v32 = vld [vmem:[#allocation2 + $0x70] sm:$0xff] }
 0x808   :  { %v2072_v43 = vpop.f32.mrb[19].mxu0  ;;  %v1355_v40 = vsel %vm379_vm2, %v1348_v38, -inf  ;;  %v2152_v34 = vpack.c.bf16 %v1657_v33, %v1656_v32 }
 0x809   :  { %1356 = vmax.xlane.f32.xlu1 %v1355_v40  ;;  %v1748_v40 = vld [vmem:[%s2585_s2 + $0x18] sm:$0xff] }
 0x892   :  { %v1354_v0 = vpop.xlane.xlu0 %1353 }
 0x893   :  { %v1358_v44 = vsub.f32 %v1275_v30, %v1354_v0 }
 0x895   :  { %v1360_v46 = vmul.f32 1.442695, %v1358_v44  ;;  %v1749_v44 = vld [vmem:[%s2585_s2 + $0x20] sm:$0xff] }
 0x896   :  { %v1357_v47 = vpop.xlane.xlu1 %1356 }
 0x897   :  { %2204 = vpow2.f32 %v1360_v46  ;;  %v1359_v48 = vsub.f32 %v1348_v38, %v1357_v47  ;;  %v1747_v38 = vld [vmem:[%s2585_s2 + $0x10] sm:$0xff]  ;;  %v1750_v46 = vld [vmem:[%s2585_s2 + $0x28] sm:$0xff] }
 0x898   :  { %v2160_v0 = vpack.c.bf16 %v1748_v40, %v1747_v38  ;;  %v2164_v47 = vpack.c.bf16 %v1750_v46, %v1749_v44 }
 0x899   :  { %v1362_v49 = vmul.f32 1.442695, %v1359_v48 }
 0x89b   :  { %2206 = vpow2.f32 %v1362_v49 }
 0x8a1   :  { %v2205_v42 = vpop.eup %2204 }
 0x8a2   :  { %v1364_v50 = vsel %vm379_vm2, %v2205_v42, 0.0 }
 0x8a3   :  { %1365 = vadd.xlane.f32.xlu0 %v1364_v50 }
 0x8a5   :  { %v2207_v51 = vpop.eup %2206 }
 0x8a6   :  { %v1367_v52 = vsel %vm379_vm2, %v2207_v51, 0.0 }
 0x8a7   :  { %1368 = vadd.xlane.f32.xlu1 %v1367_v52 }
 0x930   :  { %v1366_v53 = vpop.xlane.xlu0 %1365 }
 0x931   :  { %2208 = vrcp.f32 %v1366_v53  ;;  %v1644_v53 = vsub.s32 4, %v2339_v22 }
 0x934   :  { %v1369_v54 = vpop.xlane.xlu1 %1368 }
 0x935   :  { %2210 = vrcp.f32 %v1369_v54  ;;  %v1650_v54 = vsub.s32 5, %v2339_v22 }
 0x937   :  { %v1651_v60 = vrot.slane %v2353_v27, %v1650_v54 }
 0x93b   :  { %v2209_v55 = vpop.eup %2208 }
 0x93c   :  { %v1371_v56 = vmul.f32 %v2209_v55, %v2205_v42  ;;  %v1645_v55 = vrot.slane %v2353_v27, %v1644_v53 }
 0x93e   :  { %2076 = vmatmul.mubr.msk.f32.vlgmr.msra.gmra.mrb[14].mxu1 %vm379_vm2, %v1371_v56 }
 0x93f   :  { %v2211_v57 = vpop.eup %2210  ;;  %2143 = vmatpush3.bf16.msra.mxu1 %v2140_v61 }
 0x940   :  { %v1373_v58 = vmul.f32 %v2211_v57, %v2207_v51  ;;  %2145 = vmatprep.subr.bf16.mxu1 %v2144_v3 }
 0x942   :  { %2081 = vmatmul.mubr.msk.f32.vlgmr.msra.gmra.mrb[20].mxu0 %vm379_vm2, %v1373_v58 }
 0x943   :  { %2147 = vmatpush3.bf16.msra.mxu1 %v2144_v3 }
 0xa11   :  { %v1443_v4 = vpop.f32.mrb[14].mxu1 }
 0xa12   :  { %v1520_v5 = vmul.f32 %v1443_v4, %v2478_v19  ;;  %v2077_v6 = vpop.f32.mrb[15].mxu1  ;;  %v1751_v4 = vld [vmem:[%s2585_s2 + $0x30] sm:$0xff] }
 0xa14   :  { %v1522_v7 = vadd.f32 %v1520_v5, %v1198_v45  ;;  %v1752_v5 = vld [vmem:[%s2585_s2 + $0x38] sm:$0xff] }
 0xa15   :  { %v1516_v8 = vpop.f32.mrb[20].mxu0  ;;  %v2168_v6 = vpack.c.bf16 %v1752_v5, %v1751_v4 }
 0xa16   :  { %v1521_v9 = vmul.f32 %v1516_v8, %v2478_v19  ;;  %v2082_v10 = vpop.f32.mrb[21].mxu0  ;;  %2091 = vmatprep.mubr.msk.f32.mxu1 %vm62_vm0, %v1522_v7  ;;  %v1661_v7 = vrot.slane %v2353_v27, %v878_v41 }
 0xa18   :  { %v1523_v29 = vadd.f32 %v1521_v9, %v1199_v39  ;;  %v1746_v39 = vld [vmem:[%s2585_s2 + $0x8] sm:$0xff]  ;;  %s2273_s2 = smov [#allocation5]  }
 0xa19   :  { %v2156_v43 = vpack.c.bf16 %v1746_v39, %v1745_v35  ;;  %v1869_v35 = vsub.s32 6, %v2339_v22  ;;  %v1875_v39 = vsub.s32 7, %v2339_v22  ;;  %s1886_s28 = sshll.u32 %s2273_s2, 4  ;;  %s1887_s28 = int_to_ptr.vmem [resolvable:$true] %s1886_s28 }
 0xa1a   :  { %2092 = vmatmul.mubr.msk.f32.vlgmr.msra.gmra.mrb[16].mxu1 %vm62_vm0, %v1523_v29  ;;  %s2242_s1 = scalar_lea.vmem %s1887_s28, 256  ;;  %p2247_p9 = scmp.lt.s32.totalorder %s1887_s28, %s1887_s28 }
 0xa1b   :  { %2157 = vmatprep.subr.bf16.mxu1 %v2156_v43  ;;  %v1870_v38 = vrot.slane %v2353_v27, %v1869_v35  ;;  %v1876_v44 = vrot.slane %v2353_v27, %v1875_v39  ;;  %p2243_p8 = scmp.ne.s32.totalorder %s1887_s28, %s2242_s1  ;;  %p2248_p10 = scmp.lt.s32.totalorder %s2242_s1, %s2242_s1 }
 0xa1c   :  { %2159 = vmatpush3.bf16.msra.mxu1 %v2156_v43 }
 0xa1d   :  { %2161 = vmatprep.subr.bf16.mxu1 %v2160_v0  ;;  %p2249_p11 = por %p2248_p10, %p2247_p9 }
 0xa1f   :  { %p2250_p12 = pnand %p2249_p11, %p2243_p8 }
 0xa20   :  { %2163 = vmatpush3.bf16.msra.mxu1 %v2160_v0 }
 0xa21   :  { %2165 = vmatprep.subr.bf16.mxu1 %v2164_v47 }
 0xa24   :  { %2167 = vmatpush3.bf16.msra.mxu1 %v2164_v47 }
 0xa25   :  { %2169 = vmatprep.subr.bf16.mxu1 %v2168_v6 }
 0xa28   :  { %2171 = vmatpush3.bf16.msra.mxu1 %v2168_v6 }
 0xaed   :  { %v2093_v11 = vpop.f32.mrb[16].mxu1 }
 0xaee   :  { %v1610_v12 = vadd.f32 %v2093_v11, %v1531_v2  ;;  %v1604_v13 = vpop.f32.mrb[17].mxu1 }
 0xaef   :  { %v1605_v14 = vadd.f32 %v1604_v13, %v1531_v2 }
 0xaf0   :  { %v1614_v15 = vadd.f32 %v1610_v12, %v2326_v17  ;;  %v1756_v12 = vrot.slane %v2353_v27, %v1202_v18 }
 0xaf1   :  { %v1613_v20 = vadd.f32 %v1605_v14, %v2318_v16  ;;  %v1654_v16 = vld [vmem:[#allocation2 + $0x20] sm:$0xff] }
 0xaf2   :  { %v1618_v19 = vsel %vm62_vm0, %v1614_v15, 0.0  ;;  %v2148_v30 = vpack.c.bf16 %v1655_v28, %v1654_v16 }
 0xaf3   :  { %1619 = vadd.xlane.f32.xlu1 %v1618_v19  ;;  %v1615_v21 = vsel %vm62_vm0, %v1613_v20, 0.0 }
 0xaf4   :  { %1616 = vadd.xlane.f32.xlu0 %v1615_v21  ;;  %2149 = vmatprep.subr.bf16.mxu0 %v2148_v30 }
 0xaf5   :  { %2151 = vmatpush3.bf16.msra.mxu0 %v2148_v30 }
 0xaf6   :  { %2153 = vmatprep.subr.bf16.mxu0 %v2152_v34 }
 0xaf9   :  { %2155 = vmatpush3.bf16.msra.mxu0 %v2152_v34 }
 0xb80   :  { %v1620_v23 = vpop.xlane.xlu1 %1619 }
 0xb81   :  { %v1623_v24 = vmul.f32 0.03125, %v1620_v23  ;;  %v1617_v26 = vpop.xlane.xlu0 %1616 }
 0xb82   :  { %v1622_v25 = vmul.f32 0.03125, %v1617_v26 }
 0xb83   :  { %v1625_v31 = vsub.f32 %v1614_v15, %v1623_v24 }
 0xb84   :  { %v1624_v1 = vsub.f32 %v1613_v20, %v1622_v25 }
 0xb85   :  { %v1627_v36 = vmul.f32 %v1625_v31, %v1625_v31 }
 0xb86   :  { %v1626_v37 = vmul.f32 %v1624_v1, %v1624_v1 }
 0xb87   :  { %v1631_v45 = vsel %vm62_vm0, %v1627_v36, 0.0 }
 0xb88   :  { %1632 = vadd.xlane.f32.xlu1 %v1631_v45  ;;  %v1628_v17 = vsel %vm62_vm0, %v1626_v37, 0.0 }
 0xb89   :  { %1629 = vadd.xlane.f32.xlu0 %v1628_v17 }
 0xc15   :  { %v1633_v48 = vpop.xlane.xlu1 %1632 }
 0xc16   :  { %v1635_v49 = vmul.f32 0.03125, %v1633_v48  ;;  %v1630_v42 = vpop.xlane.xlu0 %1629 }
 0xc17   :  { %v1634_v50 = vmul.f32 0.03125, %v1630_v42 }
 0xc18   :  { %v1637_v51 = vadd.f32 1e-05, %v1635_v49 }
 0xc19   :  { %v1636_v52 = vadd.f32 1e-05, %v1634_v50 }
 0xc1a   :  { %2212 = vrsqrt.f32 %v1637_v51 }
 0xc1b   :  { %2214 = vrsqrt.f32 %v1636_v52 }
 0xc24   :  { %v2213_v56 = vpop.eup %2212 }
 0xc25   :  { %v2215_v57 = vpop.eup %2214  ;;  %v1641_v58 = vmul.f32 %v2213_v56, %v1625_v31 }
 0xc26   :  { %v1640_v59 = vmul.f32 %v2215_v57, %v1624_v1 }
 0xc27   :  { %v1647_v61 = vmul.f32 %v1645_v55, %v1641_v58 }
 0xc28   :  { %v1646_v62 = vmul.f32 %v1645_v55, %v1640_v59 }
 0xc29   :  { %v1653_v3 = vadd.f32 %v1651_v60, %v1647_v61 }
 0xc2a   :  { %v1652_v63 = vadd.f32 %v1651_v60, %v1646_v62 }
 0xc2c   :  { %2102 = vmatprep.mubr.msk.f32.mxu0 %vm62_vm0, %v1652_v63 }
 0xc2d   :  { %2103 = vmatmul.mubr.msk.f32.vlgmr.msra.gmra.mrb[22].mxu0 %vm62_vm0, %v1653_v3 }
 0xd00   :  { %v2104_v8 = vpop.f32.mrb[22].mxu0 }
 0xd01   :  { %v1740_v9 = vadd.f32 %v2104_v8, %v1661_v7  ;;  %v1734_v10 = vpop.f32.mrb[23].mxu0 }
 0xd02   :  { %v1735_v29 = vadd.f32 %v1734_v10, %v1661_v7 }
 0xd03   :  { %v1744_v11 = vmax.f32 %v1740_v9, 0.0 }
 0xd04   :  { %v1743_v2 = vmax.f32 %v1735_v29, 0.0 }
 0xd06   :  { %2121 = vmatprep.mubr.msk.f32.mxu1 %vm1757_vm3, %v1743_v2 }
 0xd07   :  { %2122 = vmatmul.mubr.msk.f32.vlgmr.msra.gmra.mrb[18].mxu1 %vm1757_vm3, %v1744_v11 }
 0xdda   :  { %v2123_v13 = vpop.f32.mrb[18].mxu1 }
 0xddb   :  { %v1836_v14 = vadd.f32 %v2123_v13, %v1756_v12  ;;  %v1830_v15 = vpop.f32.mrb[19].mxu1 }
 0xddc   :  { %v1831_v20 = vadd.f32 %v1830_v15, %v1756_v12 }
 0xddd   :  { %v1840_v19 = vadd.f32 %v1836_v14, %v1653_v3 }
 0xdde   :  { %v1839_v21 = vadd.f32 %v1831_v20, %v1652_v63 }
 0xddf   :  { %v1844_v41 = vsel %vm62_vm0, %v1840_v19, 0.0 }
 0xde0   :  { %1845 = vadd.xlane.f32.xlu1 %v1844_v41  ;;  %v1841_v23 = vsel %vm62_vm0, %v1839_v21, 0.0 }
 0xde1   :  { %1842 = vadd.xlane.f32.xlu0 %v1841_v23 }
 0xe6d   :  { %v1846_v24 = vpop.xlane.xlu1 %1845 }
 0xe6e   :  { %v1848_v26 = vmul.f32 0.03125, %v1846_v24  ;;  %v1843_v25 = vpop.xlane.xlu0 %1842 }
 0xe6f   :  { %v1847_v31 = vmul.f32 0.03125, %v1843_v25 }
 0xe70   :  { %v1850_v1 = vsub.f32 %v1840_v19, %v1848_v26 }
 0xe71   :  { %v1849_v36 = vsub.f32 %v1839_v21, %v1847_v31 }
 0xe72   :  { %v1852_v37 = vmul.f32 %v1850_v1, %v1850_v1 }
 0xe73   :  { %v1851_v18 = vmul.f32 %v1849_v36, %v1849_v36 }
 0xe74   :  { %v1856_v45 = vsel %vm62_vm0, %v1852_v37, 0.0 }
 0xe75   :  { %1857 = vadd.xlane.f32.xlu1 %v1856_v45  ;;  %v1853_v17 = vsel %vm62_vm0, %v1851_v18, 0.0 }
 0xe76   :  { %1854 = vadd.xlane.f32.xlu0 %v1853_v17 }
 0xf02   :  { %v1858_v16 = vpop.xlane.xlu1 %1857 }
 0xf03   :  { %v1860_v28 = vmul.f32 0.03125, %v1858_v16  ;;  %v1855_v30 = vpop.xlane.xlu0 %1854 }
 0xf04   :  { %v1859_v32 = vmul.f32 0.03125, %v1855_v30 }
 0xf05   :  { %v1862_v33 = vadd.f32 1e-05, %v1860_v28 }
 0xf06   :  { %v1861_v34 = vadd.f32 1e-05, %v1859_v32 }
 0xf07   :  { %2216 = vrsqrt.f32 %v1862_v33 }
 0xf08   :  { %2218 = vrsqrt.f32 %v1861_v34 }
 0xf11   :  { %v2217_v43 = vpop.eup %2216 }
 0xf12   :  { %v2219_v40 = vpop.eup %2218  ;;  %v1866_v0 = vmul.f32 %v2217_v43, %v1850_v1 }
 0xf13   :  { %v1865_v46 = vmul.f32 %v2219_v40, %v1849_v36 }
 0xf14   :  { %v1872_v47 = vmul.f32 %v1870_v38, %v1866_v0 }
 0xf15   :  { %v1871_v48 = vmul.f32 %v1870_v38, %v1865_v46 }
 0xf16   :  { %v1878_v49 = vadd.f32 %v1876_v44, %v1872_v47 }
 0xf17   :  { %v1877_v42 = vadd.f32 %v1876_v44, %v1871_v48 }
 0xf18   :  { %1880 = vst.msk [vmem:[#allocation5 + $0x8] sm:$0xff] %vm62_vm0, %v1878_v49 }
 0xf19   :  { %1879 = vst.msk [vmem:[#allocation5] sm:$0xff] %vm62_vm0, %v1877_v42 }
 0xf1a   :  { %2253 = shalt.err (!%p2250_p12)
}
 0xf1b   :  { %s2254_s5 = scalar_lea.hbm %s2587_s4, 256 }
 0xf1c   :  { %p2255_p13 = scmp.ne.s32.totalorder %s2587_s4, %s2254_s5  ;;  %p2258_p0 = scmp.lt.u32.totalorder %s2254_s5, %s2587_s4 }
 0xf1e   :  { %p2260_p1 = pnand %p2258_p0, %p2255_p13 }
 0xf20   :  { %2263 = shalt.err (!%p2260_p1)
}
 0xf21   :  { %s2274_s9 = smov 128   ;;  %s2275_s10 = smov 8  }
 0xf22   :  { %1892 = dma.vmem_to_hbm [thread:$0]  %s1887_s28, 256, %s2587_s4, [#allocation4], %s2274_s9, %s2274_s9, %s2275_s10  }
 0xf23   :  { %2266 = dma.done.wait [#allocation4], 256  }
 0xf24   :  { %2267 = vsyncadd [#allocation4], 4294967040 }
 0xf25   :  { %1896 = vsyncpa [#allocation3], 1 }
 0xf26   :  { %1897 = vsyncpa [#allocation4], 1 }

</bundles_post_ra>
